<compile_context>
chip_gen: v7x
topology: tpu7x:2x2x1
jax: 0.10.0
libtpu: 0.0.40
codegen_flags: <defaults>
</compile_context>

<pallas_src>
import functools

import jax
import jax.numpy as jnp
from jax.experimental import pallas as pl
from jax.experimental.pallas import tpu as pltpu


def _round_up(x, m):
    return ((x + m - 1) // m) * m


def rnn_chunk_kernel(pre_ref, h0_ref, wh_ref, out_ref, state_ref, *,
                     chunk, seq_len, output_size, guard_tail):
    """One grid step = `chunk` recurrence steps for one batch block.

    Fused lane layout of `state` / `pre` / `out` tiles (n_pad = 128-multiple):
        [0:O)      logits   (i2o)
        [O:O+H)    hidden   (i2h)
        [O+H:)     zero padding (matching Wh rows are zero)
    """
    c = pl.program_id(1)  # time-chunk index (last, sequential grid axis)

    # One-time (per batch block) init of the VMEM-resident carried state.
    @pl.when(c == 0)
    def _():
        state_ref[...] = h0_ref[...]

    O = output_size
    rows, lanes = state_ref.shape

    # Hoisted out of the unrolled loop (JAX does not CSE broadcasts / reloads).
    wh = wh_ref[...]
    col = jax.lax.broadcasted_iota(jnp.int32, (rows, lanes), 1)
    is_logit = col < O
    neg_inf = jnp.float32(-jnp.inf)

    def step(i, state):
        # Only the recurrent matmul lives on the serial critical path.
        fused = pre_ref[i] + jnp.dot(state.astype(wh.dtype), wh,
                                     preferred_element_type=jnp.float32)

        # Log-softmax over the logit lanes only (padded lanes masked out of the
        # normalizer); store 0 in non-logit lanes so the padded output is NaN-safe.
        masked = jnp.where(is_logit, fused, neg_inf)
        m = jnp.max(masked, axis=1, keepdims=True)
        e = jnp.exp(masked - m)
        lse = jnp.log(jnp.sum(e, axis=1, keepdims=True))
        logp = jnp.where(is_logit, masked - m - lse, 0.0)
        out_ref[i] = logp.astype(out_ref.dtype)

        if guard_tail:
            # Time axis padded up to a chunk multiple: keep the state of the
            # last *valid* step so the returned final hidden is correct.
            t_global = c * chunk + i
            fused = jnp.where(t_global < seq_len, fused, state)
        return fused

    state_ref[...] = jax.lax.fori_loop(0, chunk, step, state_ref[...],
                                       unroll=chunk <= 16)


def prepare_rnn_params(w_i2h, b_i2h, w_i2o, b_i2o, input_size,
                       wh_dtype=jnp.bfloat16):
    """One-time weight prep: transpose, fuse i2o+i2h, pad fan-out to 128 lanes.

    Returns:
      w_x : (I, n_pad) f32   -- used in the hoisted (parallel) input projection
      w_h : (n_pad, n_pad)   -- recurrent weight (rows [O:O+H) nonzero), bf16
      bias: (1, n_pad) f32   -- fused bias, folded into the hoisted projection
    """
    H = w_i2h.shape[0]
    O = w_i2o.shape[0]
    I = input_size
    N = O + H
    n_pad = _round_up(max(N, 128), 128)

    # combined = [x, h]  ->  fused = combined @ W_f, logits first then hidden.
    w_f = jnp.concatenate([w_i2o.T, w_i2h.T], axis=1).astype(jnp.float32)  # (I+H, N)
    w_f = jnp.pad(w_f, ((0, 0), (0, n_pad - N)))                           # (I+H, n_pad)

    w_x = w_f[:I]                                                          # (I, n_pad)
    w_h = (jnp.zeros((n_pad, n_pad), jnp.float32)
           .at[O:O + H].set(w_f[I:])).astype(wh_dtype)                     # (n_pad, n_pad)
    bias = jnp.pad(jnp.concatenate([b_i2o, b_i2h]).astype(jnp.float32),
                   (0, n_pad - N)).reshape(1, n_pad)                       # (1, n_pad)
    return w_x, w_h, bias


def rnn_sequence(xs, hidden0, w_x, w_h, bias, *, hidden_size, output_size,
                 time_chunk=8, batch_block=None):
    """Run the recurrence over xs: (T, B, I) with hidden0: (B, H).

    Returns (log_probs: (T, B, O), final_hidden: (B, H)).
    """
    T, B, I = xs.shape
    H, O = hidden_size, output_size
    n_pad = w_h.shape[1]

    b_pad = _round_up(max(B, 8), 8)
    bb = b_pad if batch_block is None else _round_up(min(batch_block, b_pad), 8)
    b_pad = _round_up(b_pad, bb)
    n_bblocks = b_pad // bb

    chunk = int(max(1, min(time_chunk, T)))
    n_chunks = pl.cdiv(T, chunk)
    T_pad = n_chunks * chunk

    xs_p = jnp.zeros((T_pad, b_pad, I), jnp.float32).at[:T, :B].set(
        xs.astype(jnp.float32))
    h0_p = jnp.zeros((b_pad, n_pad), jnp.float32).at[:B, O:O + H].set(
        hidden0.astype(jnp.float32))

    # Hoisted, fully parallel input projection + bias: one big MXU-friendly
    # matmul outside the serial recurrence.
    pre = (jnp.dot(xs_p.reshape(T_pad * b_pad, I), w_x,
                   preferred_element_type=jnp.float32,
                   precision=jax.lax.Precision.HIGHEST)
           + bias).reshape(T_pad, b_pad, n_pad)

    kernel = functools.partial(rnn_chunk_kernel, chunk=chunk, seq_len=T,
                               output_size=O, guard_tail=(T_pad != T))

    # VMEM budget (v7x has only 64 MiB physical / 32 MiB default scoped).
    wh_bytes = n_pad * n_pad * w_h.dtype.itemsize
    chunk_bytes = chunk * bb * n_pad * 4
    working_set = (wh_bytes                 # resident Wh
                   + 2 * chunk_bytes        # double-buffered pre chunk
                   + 2 * chunk_bytes        # double-buffered out chunk
                   + 4 * bb * n_pad * 4)    # h0 + carried state buffers
    vmem_limit = int(min(100 << 20, max(16 << 20, 2 * working_set)))

    flops = 2 * T_pad * b_pad * n_pad * n_pad + 8 * T_pad * b_pad * n_pad
    transcendentals = T_pad * b_pad * (n_pad + 1)
    bytes_accessed = (2 * T_pad * b_pad * n_pad * 4   # pre in + log-probs out
                      + wh_bytes + 2 * b_pad * n_pad * 4)

    out_full, state_full = pl.pallas_call(
        kernel,
        grid=(n_bblocks, n_chunks),
        in_specs=[
            pl.BlockSpec((chunk, bb, n_pad), lambda b, c: (c, b, 0)),   # pre[t] chunk
            pl.BlockSpec((bb, n_pad), lambda b, c: (b, 0)),             # h0 (resident)
            pl.BlockSpec((n_pad, n_pad), lambda b, c: (0, 0)),          # Wh (resident)
        ],
        out_specs=(
            pl.BlockSpec((chunk, bb, n_pad), lambda b, c: (c, b, 0)),   # log-probs chunk
            pl.BlockSpec((bb, n_pad), lambda b, c: (b, 0)),             # carried state
        ),
        out_shape=(
            jax.ShapeDtypeStruct((T_pad, b_pad, n_pad), jnp.float32),
            jax.ShapeDtypeStruct((b_pad, n_pad), jnp.float32),
        ),
        compiler_params=pltpu.CompilerParams(
            dimension_semantics=("parallel", "arbitrary"),  # batch || , time seq
            vmem_limit_bytes=vmem_limit),
        cost_estimate=pl.CostEstimate(flops=flops,
                                      transcendentals=transcendentals,
                                      bytes_accessed=bytes_accessed),
    )(pre, h0_p, w_h)

    log_probs = out_full[:T, :B, :O]          # logits live in the lane prefix
    final_hidden = state_full[:B, O:O + H]
    return log_probs, final_hidden


def rnn_forward(x, hidden, w_x, w_h, bias, *, hidden_size, output_size):
    """Single-step forward, matching the PyTorch module's forward(input, hidden)."""
    log_probs, new_hidden = rnn_sequence(
        x[None], hidden, w_x, w_h, bias,
        hidden_size=hidden_size, output_size=output_size, time_chunk=1)
    return log_probs[0], new_hidden


def init_linear_params(key, fan_in, fan_out):
    """Deterministic init mimicking nn.Linear (uniform +-1/sqrt(fan_in))."""
    kw, kb = jax.random.split(key)
    bound = 1.0 / jnp.sqrt(fan_in)
    w = jax.random.uniform(kw, (fan_out, fan_in), jnp.float32, -bound, bound)
    b = jax.random.uniform(kb, (fan_out,), jnp.float32, -bound, bound)
    return w, b


if __name__ == "__main__":
    batch = 2
    input_size = 24
    hidden_size = 32
    output_size = 16
    seq_len = 8

    key = jax.random.PRNGKey(0)
    k_x, k_h, k_i2h, k_i2o = jax.random.split(key, 4)

    xs = jax.random.normal(k_x, (seq_len, batch, input_size), jnp.float32)
    hidden0 = jnp.zeros((batch, hidden_size), jnp.float32)   # init_hidden

    w_i2h, b_i2h = init_linear_params(k_i2h, input_size + hidden_size, hidden_size)
    w_i2o, b_i2o = init_linear_params(k_i2o, input_size + hidden_size, output_size)

    # One-time weight preparation: transpose + fuse + pad (+ bf16 recurrent W).
    w_x, w_h, bias = prepare_rnn_params(w_i2h, b_i2h, w_i2o, b_i2o, input_size)

    # bf16 recurrent weights (f32 accumulate) => loosened tolerances vs f32 ref.
    TOL = dict(atol=2e-2, rtol=2e-2)

    # --- single step (== the PyTorch module forward), nonzero hidden ---------
    h_rand = jax.random.normal(k_h, (batch, hidden_size), jnp.float32) * 0.5
    out1, h1 = rnn_forward(xs[0], h_rand, w_x, w_h, bias,
                           hidden_size=hidden_size, output_size=output_size)
    jax.block_until_ready((out1, h1))

    combined = jnp.concatenate([xs[0], h_rand], axis=1)
    ref_h1 = combined @ w_i2h.T + b_i2h
    ref_out1 = jax.nn.log_softmax(combined @ w_i2o.T + b_i2o, axis=1)
    assert jnp.allclose(out1, ref_out1, **TOL), "step output mismatch"
    assert jnp.allclose(h1, ref_h1, **TOL), "step hidden mismatch"

    # --- full sequence: hoisted projection + chunked recurrent kernel --------
    outs, h_final = rnn_sequence(xs, hidden0, w_x, w_h, bias,
                                 hidden_size=hidden_size,
                                 output_size=output_size, time_chunk=8)
    jax.block_until_ready((outs, h_final))

    ref_outs = []
    h = hidden0
    for t in range(seq_len):
        c = jnp.concatenate([xs[t], h], axis=1)
        ref_outs.append(jax.nn.log_softmax(c @ w_i2o.T + b_i2o, axis=1))
        h = c @ w_i2h.T + b_i2h
    ref_outs = jnp.stack(ref_outs)
    assert jnp.allclose(outs, ref_outs, **TOL), "sequence output mismatch"
    assert jnp.allclose(h_final, h, **TOL), "sequence hidden mismatch"

    # --- non-divisible time chunk exercises the padded-tail guard ------------
    outs_c, h_final_c = rnn_sequence(xs, hidden0, w_x, w_h, bias,
                                     hidden_size=hidden_size,
                                     output_size=output_size, time_chunk=3)
    jax.block_until_ready((outs_c, h_final_c))
    assert jnp.allclose(outs_c, ref_outs, **TOL), "chunked output mismatch"
    assert jnp.allclose(h_final_c, h, **TOL), "chunked hidden mismatch"

    print("KERNEL_OK")
</pallas_src>

<mosaic_0001>
module attributes {stable_mosaic.version = 11 : i64} {
  func.func @rnn_chunk_kernel(%arg0: i32, %arg1: i32, %arg2: memref<1x8x128xf32, #tpu.memory_space<vmem>>, %arg3: memref<8x128xf32, #tpu.memory_space<vmem>>, %arg4: memref<128x128xbf16, #tpu.memory_space<vmem>>, %arg5: memref<1x8x128xf32, #tpu.memory_space<vmem>>, %arg6: memref<8x128xf32, #tpu.memory_space<vmem>>) attributes {dimension_semantics = [#tpu.dimension_semantics<parallel>, #tpu.dimension_semantics<arbitrary>], iteration_bounds = array<i64: 1, 1>, scalar_prefetch = 0 : i64, scratch_operands = 0 : i64, tpu.core_type = #tpu.core_type<tc>, window_params = [{transform_indices = @transform_0, window_bounds = array<i64: 1, 8, 128>}, {transform_indices = @transform_1, window_bounds = array<i64: 8, 128>}, {pipeline_mode = #tpu.pipeline_mode<synchronous>, transform_indices = @transform_2, window_bounds = array<i64: 128, 128>}, {transform_indices = @transform_3, window_bounds = array<i64: 1, 8, 128>}, {transform_indices = @transform_4, window_bounds = array<i64: 8, 128>}]} {
    %c0_i32 = arith.constant 0 : i32
    %0 = arith.cmpi eq, %arg1, %c0_i32 : i32
    %1 = arith.extui %0 : i1 to i32
    %c0_i32_0 = arith.constant 0 : i32
    %2 = arith.cmpi ne, %1, %c0_i32_0 : i32
    scf.if %2 {
      %c0_15 = arith.constant 0 : index
      %c0_16 = arith.constant 0 : index
      %35 = vector.load %arg3[%c0_15, %c0_16] : memref<8x128xf32, #tpu.memory_space<vmem>>, vector<8x128xf32>
      %c0_17 = arith.constant 0 : index
      %c0_18 = arith.constant 0 : index
      %36 = vector.load %arg6[%c0_17, %c0_18] : memref<8x128xf32, #tpu.memory_space<vmem>>, vector<8x128xf32>
      tpu.vector_store %arg6[%c0_17, %c0_18], %35 {strides = array<i32>} : memref<8x128xf32, #tpu.memory_space<vmem>>, vector<8x128xf32>,
    } else {
    }
    %c0 = arith.constant 0 : index
    %c0_1 = arith.constant 0 : index
    %3 = vector.load %arg4[%c0, %c0_1] : memref<128x128xbf16, #tpu.memory_space<vmem>>, vector<128x128xbf16>
    %4 = tpu.iota {dimensions = array<i32: 1>} : vector<8x128xi32>
    %c16_i32 = arith.constant 16 : i32
    %5 = vector.broadcast %c16_i32 : i32 to vector<8x128xi32>
    %6 = arith.cmpi slt, %4, %5 : vector<8x128xi32>
    %c0_2 = arith.constant 0 : index
    %c0_3 = arith.constant 0 : index
    %7 = vector.load %arg6[%c0_2, %c0_3] : memref<8x128xf32, #tpu.memory_space<vmem>>, vector<8x128xf32>
    %cst = arith.constant 0xFF800000 : f32
    %c0_i32_4 = arith.constant 0 : i32
    %8 = arith.index_cast %c0_i32_4 : i32 to index
    %c0_5 = arith.constant 0 : index
    %c0_6 = arith.constant 0 : index
    %9 = vector.load %arg2[%8, %c0_5, %c0_6] : memref<1x8x128xf32, #tpu.memory_space<vmem>>, vector<1x8x128xf32>
    %10 = vector.shape_cast %9 : vector<1x8x128xf32> to vector<8x128xf32>
    %11 = arith.truncf %7 : vector<8x128xf32> to vector<8x128xbf16>
    %cst_7 = arith.constant dense<0.000000e+00> : vector<8x128xf32>
    %12 = tpu.matmul %11, %3, %cst_7 {dimension_numbers = #tpu.dot_dimension_numbers<[1], [0], [0], [1], [0, 0, 1, 1], [], []>} : vector<8x128xbf16>, vector<128x128xbf16>, vector<8x128xf32> -> vector<8x128xf32>
    %13 = arith.addf %10, %12 : vector<8x128xf32>
    %14 = vector.broadcast %cst : f32 to vector<8x128xf32>
    %15 = arith.select %6, %13, %14 : vector<8x128xi1>, vector<8x128xf32>
    %cst_8 = arith.constant dense<0xFF800000> : vector<8xf32>
    %16 = vector.multi_reduction <maximumf>, %15, %cst_8 [1] : vector<8x128xf32> to vector<8xf32>
    %17 = vector.shape_cast %16 : vector<8xf32> to vector<8x1xf32>
    %18 = vector.broadcast %17 : vector<8x1xf32> to vector<8x128xf32>
    %19 = arith.subf %15, %18 : vector<8x128xf32>
    %20 = math.exp %19 : vector<8x128xf32>
    %cst_9 = arith.constant dense<0.000000e+00> : vector<8xf32>
    %21 = vector.multi_reduction <add>, %20, %cst_9 [1] : vector<8x128xf32> to vector<8xf32>
    %22 = vector.shape_cast %21 : vector<8xf32> to vector<8x1xf32>
    %23 = math.log %22 : vector<8x1xf32>
    %24 = vector.broadcast %17 : vector<8x1xf32> to vector<8x128xf32>
    %25 = arith.subf %15, %24 : vector<8x128xf32>
    %26 = vector.broadcast %23 : vector<8x1xf32> to vector<8x128xf32>
    %27 = arith.subf %25, %26 : vector<8x128xf32>
    %cst_10 = arith.constant 0.000000e+00 : f32
    %28 = vector.broadcast %cst_10 : f32 to vector<8x128xf32>
    %29 = arith.select %6, %27, %28 : vector<8x128xi1>, vector<8x128xf32>
    %30 = arith.index_cast %c0_i32_4 : i32 to index
    %c0_11 = arith.constant 0 : index
    %c0_12 = arith.constant 0 : index
    %31 = vector.load %arg5[%30, %c0_11, %c0_12] : memref<1x8x128xf32, #tpu.memory_space<vmem>>, vector<1x8x128xf32>
    %32 = vector.shape_cast %31 : vector<1x8x128xf32> to vector<8x128xf32>
    %33 = vector.shape_cast %29 : vector<8x128xf32> to vector<1x8x128xf32>
    tpu.vector_store %arg5[%30, %c0_11, %c0_12], %33 {strides = array<i32>} : memref<1x8x128xf32, #tpu.memory_space<vmem>>, vector<1x8x128xf32>,
    %c1_i32 = arith.constant 1 : i32
    %c0_13 = arith.constant 0 : index
    %c0_14 = arith.constant 0 : index
    %34 = vector.load %arg6[%c0_13, %c0_14] : memref<8x128xf32, #tpu.memory_space<vmem>>, vector<8x128xf32>
    tpu.vector_store %arg6[%c0_13, %c0_14], %13 {strides = array<i32>} : memref<8x128xf32, #tpu.memory_space<vmem>>, vector<8x128xf32>,
    return
  }
  func.func @transform_0(%arg0: i32, %arg1: i32) -> (i32, i32, i32) {
    %c0_i32 = arith.constant 0 : i32
    %c0_i32_0 = arith.constant 0 : i32
    return %arg1, %arg0, %c0_i32 : i32, i32, i32
  }
  func.func @transform_1(%arg0: i32, %arg1: i32) -> (i32, i32) {
    %c0_i32 = arith.constant 0 : i32
    %c0_i32_0 = arith.constant 0 : i32
    return %arg0, %c0_i32 : i32, i32
  }
  func.func @transform_2(%arg0: i32, %arg1: i32) -> (i32, i32) {
    %c0_i32 = arith.constant 0 : i32
    %c0_i32_0 = arith.constant 0 : i32
    %c0_i32_1 = arith.constant 0 : i32
    return %c0_i32, %c0_i32_0 : i32, i32
  }
  func.func @transform_3(%arg0: i32, %arg1: i32) -> (i32, i32, i32) {
    %c0_i32 = arith.constant 0 : i32
    %c0_i32_0 = arith.constant 0 : i32
    return %arg1, %arg0, %c0_i32 : i32, i32, i32
  }
  func.func @transform_4(%arg0: i32, %arg1: i32) -> (i32, i32) {
    %c0_i32 = arith.constant 0 : i32
    %c0_i32_0 = arith.constant 0 : i32
    return %arg0, %c0_i32 : i32, i32
  }
}

</mosaic_0001>

<bundles_post_ra>
// kernel: tpu_custom_call.1
= control target key start
LH: loop header
LB: loop body
LE: loop exit
PB: predicated region body
PF: predicated region fallthrough
CT: control target
= control target key end

     0   :  { %10 = vsyncpa [#allocation3], 0  ;;  %s489_s0 = inlined_call_operand.hbm [shape: f32[1,8,128], index: 0, kind: input, shape index: {}]   ;;  %s490_s1 = inlined_call_operand.hbm [shape: f32[8,128], index: 1, kind: input, shape index: {}]   ;;  %s491_s2 = inlined_call_operand.hbm [shape: bf16[128,128], index: 2, kind: input, shape index: {}]   ;;  %s492_s3 = inlined_call_operand.hbm [shape: f32[1,8,128], index: 3, kind: output, shape index: {0}]   ;;  %s493_s4 = inlined_call_operand.hbm [shape: f32[8,128], index: 4, kind: output, shape index: {1}]  }
   0x1   :  { %11 = vsyncpa [#allocation6], 0 }
   0x2   :  { %12 = vsyncpa [#allocation4], 0 }
   0x3   :  { %13 = vsyncpa [#allocation10], 0  ;;  %s393_s15 = smov [#allocation5]   ;;  %s394_s17 = smov [#allocation2]  }
   0x4   :  { %s30_s16 = sshll.u32 %s393_s15, 4  ;;  %s20_s18 = sshll.u32 %s394_s17, 4  ;;  %s31_s16 = int_to_ptr.vmem [resolvable:$true] %s30_s16  ;;  %s21_s18 = int_to_ptr.vmem [resolvable:$true] %s20_s18 }
   0x5   :  { %s275_s21 = scalar_lea.hbm %s490_s1, 128 }
   0x6   :  { %p276_p0 = scmp.ne.s32.totalorder %s490_s1, %s275_s21  ;;  %p279_p1 = scmp.lt.u32.totalorder %s275_s21, %s490_s1 }
   0x8   :  { %p281_p2 = pnand %p279_p1, %p276_p0 }
   0xa   :  { %284 = shalt.err (!%p281_p2)
}
   0xb   :  { %s285_s26 = scalar_lea.vmem %s31_s16, 128  ;;  %p290_p4 = scmp.lt.s32.totalorder %s31_s16, %s31_s16 }
   0xc   :  { %p286_p3 = scmp.ne.s32.totalorder %s31_s16, %s285_s26  ;;  %p291_p5 = scmp.lt.s32.totalorder %s285_s26, %s285_s26 }
   0xe   :  { %p292_p6 = por %p291_p5, %p290_p4 }
  0x10   :  { %p293_p7 = pnand %p292_p6, %p286_p3 }
  0x12   :  { %296 = shalt.err (!%p293_p7)
}
  0x13   :  { %33 = dma.hbm_to_vmem [thread:$0]  %s490_s1, 128, %s31_s16, [#allocation6]  }
  0x14   :  { %s297_s5 = scalar_lea.hbm %s489_s0, 128 }
  0x15   :  { %p298_p8 = scmp.ne.s32.totalorder %s489_s0, %s297_s5  ;;  %p301_p9 = scmp.lt.u32.totalorder %s297_s5, %s489_s0 }
  0x17   :  { %p303_p10 = pnand %p301_p9, %p298_p8 }
  0x19   :  { %306 = shalt.err (!%p303_p10)
}
  0x1a   :  { %s307_s10 = scalar_lea.vmem %s21_s18, 128  ;;  %p312_p12 = scmp.lt.s32.totalorder %s21_s18, %s21_s18 }
  0x1b   :  { %p308_p11 = scmp.ne.s32.totalorder %s21_s18, %s307_s10  ;;  %p313_p13 = scmp.lt.s32.totalorder %s307_s10, %s307_s10 }
  0x1d   :  { %p314_p0 = por %p313_p13, %p312_p12 }
  0x1f   :  { %p315_p1 = pnand %p314_p0, %p308_p11 }
  0x21   :  { %318 = shalt.err (!%p315_p1)
}
  0x22   :  { %23 = dma.hbm_to_vmem [thread:$0]  %s489_s0, 128, %s21_s18, [#allocation3]  }
  0x23   :  { %s395_s12 = smov [#allocation7]   ;;  %s319_s16 = scalar_lea.hbm %s491_s2, 1024 }
  0x24   :  { %s39_s13 = sshll.u32 %s395_s12, 4  ;;  %p320_p2 = scmp.ne.s32.totalorder %s491_s2, %s319_s16  ;;  %s40_s13 = int_to_ptr.vmem [resolvable:$true] %s39_s13 }
  0x25   :  { %p323_p3 = scmp.lt.u32.totalorder %s319_s16, %s491_s2 }
  0x27   :  { %p325_p4 = pnand %p323_p3, %p320_p2 }
  0x29   :  { %328 = shalt.err (!%p325_p4)
}
  0x2a   :  { %s329_s22 = scalar_lea.vmem %s40_s13, 1024  ;;  %p334_p6 = scmp.lt.s32.totalorder %s40_s13, %s40_s13 }
  0x2b   :  { %p330_p5 = scmp.ne.s32.totalorder %s40_s13, %s329_s22  ;;  %p335_p7 = scmp.lt.s32.totalorder %s329_s22, %s329_s22 }
  0x2d   :  { %p336_p8 = por %p335_p7, %p334_p6 }
  0x2f   :  { %p337_p9 = pnand %p336_p8, %p330_p5 }
  0x31   :  { %340 = shalt.err (!%p337_p9)
}
  0x32   :  { %s396_s0 = smov 64   ;;  %s397_s18 = smov 4  }
  0x33   :  { %45 = dma.hbm_to_vmem [thread:$0]  %s491_s2, 1024, %s40_s13, [#allocation6], %s396_s0, %s396_s0, %s397_s18  }
  0x34   :  { %385 = dma.done.wait [#allocation3], 128  }
  0x35   :  { %386 = vsyncadd [#allocation3], 4294967168 }
  0x36   :  { %387 = dma.done.wait [#allocation6], 1152  }
  0x37   :  { %388 = vsyncadd [#allocation6], 4294966144  ;;  %v398_v0 = vmov 0.0   ;;  %vm399_vm0 = vmmov 0   ;;  %v263_v1 = vld [vmem:[#allocation7] sm:$0xff]   ;;  %v264_v2 = vld [vmem:[#allocation7 + $0x8] sm:$0xff]   ;;  %v78_v11 = vlaneseq }
  0x38   :  { %234 = vmatprep.subr.bf16.mxu0 %v398_v0  ;;  %250 = vmatprep.mubr.msk.bf16.mxu0 %vm399_vm0, %v398_v0  ;;  %v265_v3 = vld [vmem:[#allocation7 + $0x10] sm:$0xff]   ;;  %v266_v4 = vld [vmem:[#allocation7 + $0x18] sm:$0xff]   ;;  %v267_v5 = vld [vmem:[#allocation7 + $0x20] sm:$0xff]   ;;  %s400_s2 = smov [#allocation9]  }
  0x39   :  { %235 = vmatpush3.bf16.msra.mxu0 %v263_v1  ;;  %v268_v6 = vld [vmem:[#allocation7 + $0x28] sm:$0xff]   ;;  %v269_v7 = vld [vmem:[#allocation7 + $0x30] sm:$0xff]   ;;  %v270_v8 = vld [vmem:[#allocation7 + $0x38] sm:$0xff]   ;;  %v79_v12 = vand.u32 127, %v78_v11  ;;  %s203_s25 = sshll.u32 %s400_s2, 4  ;;  %s204_s25 = int_to_ptr.vmem [resolvable:$true] %s203_s25 }
  0x3a   :  { %236 = vmatprep.subr.bf16.mxu0 %v398_v0  ;;  %v60_v9 = vld [vmem:[#allocation5] sm:$0xff]  ;;  %v82_v13 = vld [vmem:[#allocation2] sm:$0xff]  ;;  %s341_s26 = scalar_lea.vmem %s204_s25, 128  ;;  %p346_p11 = scmp.lt.s32.totalorder %s204_s25, %s204_s25 }
  0x3b   :  { %v83_v10 = vpack.c.bf16 %v60_v9, %v60_v9  ;;  %vm80_vm1 = vcmp.lt.s32.totalorder %v79_v12, 16  ;;  %p342_p10 = scmp.ne.s32.totalorder %s204_s25, %s341_s26  ;;  %p347_p12 = scmp.lt.s32.totalorder %s341_s26, %s341_s26 }
  0x3d   :  { %237 = vmatpush3.bf16.msra.mxu0 %v264_v2  ;;  %p348_p13 = por %p347_p12, %p346_p11 }
  0x3e   :  { %238 = vmatprep.subr.bf16.mxu0 %v398_v0 }
  0x3f   :  { %p349_p0 = pnand %p348_p13, %p342_p10 }
  0x41   :  { %239 = vmatpush3.bf16.msra.mxu0 %v265_v3 }
  0x42   :  { %240 = vmatprep.subr.bf16.mxu0 %v398_v0 }
  0x45   :  { %241 = vmatpush3.bf16.msra.mxu0 %v266_v4 }
  0x46   :  { %242 = vmatprep.subr.bf16.mxu0 %v398_v0 }
  0x49   :  { %243 = vmatpush3.bf16.msra.mxu0 %v267_v5 }
  0x4a   :  { %244 = vmatprep.subr.bf16.mxu0 %v398_v0 }
  0x4d   :  { %245 = vmatpush3.bf16.msra.mxu0 %v268_v6 }
  0x4e   :  { %246 = vmatprep.subr.bf16.mxu0 %v398_v0 }
  0x51   :  { %247 = vmatpush3.bf16.msra.mxu0 %v269_v7 }
  0x52   :  { %248 = vmatprep.subr.bf16.mxu0 %v398_v0 }
  0x55   :  { %249 = vmatpush3.bf16.msra.mxu0 %v270_v8 }
  0x58   :  { %251 = vmatmul.mubr.bf16.vlgmr.msra.gmra.mrb[0].mxu0 %v83_v10 }
 0x12b   :  { %v166_v14 = vpop.f32.mrb[0].mxu0 }
 0x12c   :  { %v172_v15 = vadd.f32 %v166_v14, %v82_v13  ;;  %v252_v16 = vpop.f32.mrb[1].mxu0 }
 0x12d   :  { %v169_v17 = vpop.f32.mrb[2].mxu0 }
 0x12e   :  { %186 = vst [vmem:[#allocation9] sm:$0xff] %v172_v15  ;;  %v253_v18 = vpop.f32.mrb[3].mxu0  ;;  %v173_v19 = vsel %vm80_vm1, %v172_v15, -inf }
 0x12f   :  { %174 = vmax.xlane.f32.xlu0 %v173_v19 }
 0x1bc   :  { %v175_v20 = vpop.xlane.xlu0 %174 }
 0x1bd   :  { %v176_v21 = vsub.f32 %v173_v19, %v175_v20 }
 0x1bf   :  { %v177_v22 = vmul.f32 1.442695, %v176_v21 }
 0x1c1   :  { %271 = vpow2.f32 %v177_v22 }
 0x1cb   :  { %v272_v23 = vpop.eup %271 }
 0x1cc   :  { %179 = vadd.xlane.f32.xlu0 %v272_v23 }
 0x1cd   :  { %352 = shalt.err (!%p349_p0)
}
 0x1ce   :  { %s353_s29 = scalar_lea.hbm %s493_s4, 128 }
 0x1cf   :  { %p354_p1 = scmp.ne.s32.totalorder %s493_s4, %s353_s29  ;;  %p357_p2 = scmp.lt.u32.totalorder %s353_s29, %s493_s4 }
 0x1d1   :  { %p359_p3 = pnand %p357_p2, %p354_p1 }
 0x1d3   :  { %362 = shalt.err (!%p359_p3)
}
 0x1d4   :  { %206 = dma.vmem_to_hbm [thread:$0]  %s204_s25, 128, %s493_s4, [#allocation10]  }
 0x1d5   :  { %s401_s10 = smov [#allocation8]  }
 0x1d6   :  { %s193_s1 = sshll.u32 %s401_s10, 4  ;;  %s194_s1 = int_to_ptr.vmem [resolvable:$true] %s193_s1 }
 0x1d7   :  { %s363_s11 = scalar_lea.vmem %s194_s1, 128  ;;  %p368_p5 = scmp.lt.s32.totalorder %s194_s1, %s194_s1 }
 0x1d8   :  { %p364_p4 = scmp.ne.s32.totalorder %s194_s1, %s363_s11  ;;  %p369_p6 = scmp.lt.s32.totalorder %s363_s11, %s363_s11 }
 0x1da   :  { %p370_p7 = por %p369_p6, %p368_p5 }
 0x1dc   :  { %p371_p8 = pnand %p370_p7, %p364_p4 }
 0x259   :  { %v180_v24 = vpop.xlane.xlu0 %179 }
 0x25a   :  { %273 = vlog2.f32 %v180_v24 }
 0x264   :  { %v274_v25 = vpop.eup %273 }
 0x265   :  { %v182_v26 = vmul.f32 0.6931472, %v274_v25 }
 0x267   :  { %v183_v27 = vsub.f32 %v176_v21, %v182_v26 }
 0x269   :  { %v184_v28 = vsel %vm80_vm1, %v183_v27, 0.0 }
 0x26a   :  { %185 = vst [vmem:[#allocation8] sm:$0xff] %v184_v28 }
 0x26b   :  { %374 = shalt.err (!%p371_p8)
}
 0x26c   :  { %s375_s13 = scalar_lea.hbm %s492_s3, 128 }
 0x26d   :  { %p376_p9 = scmp.ne.s32.totalorder %s492_s3, %s375_s13  ;;  %p379_p10 = scmp.lt.u32.totalorder %s375_s13, %s492_s3 }
 0x26f   :  { %p381_p11 = pnand %p379_p10, %p376_p9 }
 0x271   :  { %384 = shalt.err (!%p381_p11)
}
 0x272   :  { %196 = dma.vmem_to_hbm [thread:$0]  %s194_s1, 128, %s492_s3, [#allocation4]  }
 0x273   :  { %389 = dma.done.wait [#allocation4], 128  }
 0x274   :  { %390 = vsyncadd [#allocation4], 4294967168 }
 0x275   :  { %391 = dma.done.wait [#allocation10], 128  }
 0x276   :  { %392 = vsyncadd [#allocation10], 4294967168 }
 0x277   :  { %213 = vsyncpa [#allocation3], 1 }
 0x278   :  { %214 = vsyncpa [#allocation6], 1 }
 0x279   :  { %215 = vsyncpa [#allocation4], 1 }
 0x27a   :  { %216 = vsyncpa [#allocation10], 1 }

</bundles_post_ra>
